<compile_context>
chip_gen: v7x
topology: tpu7x:2x2x1
jax: 0.10.0
libtpu: 0.0.40
codegen_flags: <defaults>
</compile_context>

<pallas_src>
import jax
import jax.numpy as jnp
from jax.experimental import pallas as pl
from jax.experimental.pallas import tpu as pltpu


def moe_kernel(xT_ref, w_ref, route_ref, oT_ref):
    # xT_ref:    (D+1, TILE_N)    tokens lane-major, last row = 1.0 (bias lane)
    # w_ref:     (2*DP, D+1)      rows [0:D] = [W1 | b1], rows [DP:DP+D] = [W2 | b2]
    # route_ref: (1, TILE_N)      int32 routing decision per token
    # oT_ref:    (D, TILE_N)
    D = oT_ref.shape[0]
    DP = w_ref.shape[0] // 2

    # Single fused MXU matmul for both experts (bias folded in):
    # (2*DP, D+1) @ (D+1, TILE_N) -> (2*DP, TILE_N), f32 accumulation.
    yT = jnp.dot(w_ref[...], xT_ref[...], preferred_element_type=jnp.float32)

    # GatherRouter: pick the expert each token was scattered to (lane-wise select).
    sel = route_ref[...] == 0                              # (1, TILE_N) bool
    y1T = yT[0:D, :]                                       # expert 1 half (8-aligned start)
    y2T = yT[DP:DP + D, :]                                 # expert 2 half (8-aligned start)
    oT_ref[...] = jnp.where(sel, y1T, y2T).astype(oT_ref.dtype)


def moe_forward(x, w1, b1, w2, b2, route, *, tile_n=2048):
    """x: (N, D) tokens; w1/w2: (D, D) in PyTorch [out, in] convention; b1/b2: (D,);
    route: (N,) int32 in {0, 1}. Returns (N, D)."""
    N, D = x.shape
    DP = 16                                   # sublane-aligned slab per expert (>= D, multiple of 8)

    # Tile size: multiple of 128 lanes; don't over-tile tiny inputs.
    assert tile_n % 128 == 0
    tile_n = min(tile_n, pl.cdiv(N, 128) * 128)
    NP = pl.cdiv(N, tile_n) * tile_n          # padded token count

    # Lane-major (transposed) input with appended ones row (bias lane), zero-padded to NP.
    xT = jnp.zeros((D + 1, NP), x.dtype)
    xT = xT.at[:D, :N].set(x.T)
    xT = xT.at[D, :].set(jnp.ones((NP,), x.dtype))
    routeT = jnp.zeros((1, NP), jnp.int32).at[:, :N].set(route.astype(jnp.int32)[None, :])

    # Fused, sublane-padded [W | b] stack. y^T = W_cat @ [x^T; 1], PyTorch [out, in]
    # weights are used directly as the MXU LHS.
    w_cat = jnp.zeros((2 * DP, D + 1), x.dtype)
    w_cat = w_cat.at[0:D, :D].set(w1).at[0:D, D].set(b1)
    w_cat = w_cat.at[DP:DP + D, :D].set(w2).at[DP:DP + D, D].set(b2)

    grid = (NP // tile_n,)
    cost = pl.CostEstimate(
        flops=2 * NP * (D + 1) * (2 * DP),
        transcendentals=0,
        bytes_accessed=4 * ((D + 1) * NP + 2 * DP * (D + 1) + NP + D * NP),
    )

    outT = pl.pallas_call(
        moe_kernel,
        out_shape=jax.ShapeDtypeStruct((D, NP), x.dtype),
        grid=grid,
        in_specs=[
            pl.BlockSpec((D + 1, tile_n), lambda i: (0, i)),       # x^T tile (+ ones row)
            pl.BlockSpec((2 * DP, D + 1), lambda i: (0, 0)),       # fused [W|b], VMEM-resident
            pl.BlockSpec((1, tile_n), lambda i: (0, i)),           # route tile
        ],
        out_specs=pl.BlockSpec((D, tile_n), lambda i: (0, i)),
        compiler_params=pltpu.CompilerParams(
            dimension_semantics=("parallel",)),
        cost_estimate=cost,
    )(xT, w_cat, routeT)

    return outT[:, :N].T                       # back to (N, D)


def reference(x, w1, b1, w2, b2, route):
    y1 = x @ w1.T + b1
    y2 = x @ w2.T + b2
    return jnp.where((route == 0)[:, None], y1, y2)


if __name__ == "__main__":
    jax.config.update("jax_default_matmul_precision", "highest")

    key = jax.random.PRNGKey(0)
    k_x, k_w1, k_b1, k_w2, k_b2, k_r = jax.random.split(key, 6)

    N, D = 256, 10                             # 256 tokens, hidden dim 10 (Linear(10,10))
    x = jax.random.normal(k_x, (N, D), dtype=jnp.float32)

    # nn.Linear-like uniform init, PyTorch [out, in] convention.
    bound = 1.0 / (D ** 0.5)
    w1 = jax.random.uniform(k_w1, (D, D), minval=-bound, maxval=bound, dtype=jnp.float32)
    b1 = jax.random.uniform(k_b1, (D,), minval=-bound, maxval=bound, dtype=jnp.float32)
    w2 = jax.random.uniform(k_w2, (D, D), minval=-bound, maxval=bound, dtype=jnp.float32)
    b2 = jax.random.uniform(k_b2, (D,), minval=-bound, maxval=bound, dtype=jnp.float32)

    # RandScatter(rand_path_num=2): deterministic per-token path assignment.
    route = jax.random.randint(k_r, (N,), 0, 2, dtype=jnp.int32)

    # tile_n=128 -> grid of 2 tiles, exercising the pipelined token loop.
    out = jax.block_until_ready(moe_forward(x, w1, b1, w2, b2, route, tile_n=128))

    ref = reference(x, w1, b1, w2, b2, route)
    assert out.shape == (N, D)
    assert jnp.allclose(out, ref, atol=1e-4, rtol=1e-4), "mismatch vs reference"
    print("KERNEL_OK")
</pallas_src>

<mosaic_0001>
module attributes {stable_mosaic.version = 11 : i64} {
  func.func @moe_kernel(%arg0: i32, %arg1: memref<11x128xf32, #tpu.memory_space<vmem>>, %arg2: memref<32x11xf32, #tpu.memory_space<vmem>>, %arg3: memref<1x128xi32, #tpu.memory_space<vmem>>, %arg4: memref<10x128xf32, #tpu.memory_space<vmem>>) attributes {dimension_semantics = [#tpu.dimension_semantics<parallel>], iteration_bounds = array<i64: 2>, scalar_prefetch = 0 : i64, scratch_operands = 0 : i64, tpu.core_type = #tpu.core_type<tc>, window_params = [{transform_indices = @transform_0, window_bounds = array<i64: 11, 128>}, {pipeline_mode = #tpu.pipeline_mode<synchronous>, transform_indices = @transform_1, window_bounds = array<i64: 32, 11>}, {transform_indices = @transform_2, window_bounds = array<i64: 1, 128>}, {transform_indices = @transform_3, window_bounds = array<i64: 10, 128>}]} {
    %c0 = arith.constant 0 : index
    %c0_0 = arith.constant 0 : index
    %0 = vector.load %arg2[%c0, %c0_0] : memref<32x11xf32, #tpu.memory_space<vmem>>, vector<32x11xf32>
    %c0_1 = arith.constant 0 : index
    %c0_2 = arith.constant 0 : index
    %1 = vector.load %arg1[%c0_1, %c0_2] : memref<11x128xf32, #tpu.memory_space<vmem>>, vector<11x128xf32>
    %cst = arith.constant dense<0.000000e+00> : vector<32x128xf32>
    %2 = tpu.matmul %0, %1, %cst {dimension_numbers = #tpu.dot_dimension_numbers<[1], [0], [0], [1], [0, 0, 1, 1], [], []>, precision = #tpu.contract_precision<fp32>} : vector<32x11xf32>, vector<11x128xf32>, vector<32x128xf32> -> vector<32x128xf32>
    %c0_3 = arith.constant 0 : index
    %c0_4 = arith.constant 0 : index
    %3 = vector.load %arg3[%c0_3, %c0_4] : memref<1x128xi32, #tpu.memory_space<vmem>>, vector<1x128xi32>
    %c0_i32 = arith.constant 0 : i32
    %4 = vector.broadcast %c0_i32 : i32 to vector<1x128xi32>
    %5 = arith.cmpi eq, %3, %4 : vector<1x128xi32>
    %6 = vector.extract_strided_slice %2 {offsets = [0, 0], sizes = [10, 128], strides = [1, 1]} : vector<32x128xf32> to vector<10x128xf32>
    %7 = vector.extract_strided_slice %2 {offsets = [16, 0], sizes = [10, 128], strides = [1, 1]} : vector<32x128xf32> to vector<10x128xf32>
    %8 = vector.shape_cast %5 : vector<1x128xi1> to vector<1x128xi1>
    %9 = vector.broadcast %8 : vector<1x128xi1> to vector<10x128xi1>
    %10 = arith.select %9, %6, %7 : vector<10x128xi1>, vector<10x128xf32>
    %c0_5 = arith.constant 0 : index
    %c0_6 = arith.constant 0 : index
    %11 = vector.load %arg4[%c0_5, %c0_6] : memref<10x128xf32, #tpu.memory_space<vmem>>, vector<10x128xf32>
    tpu.vector_store %arg4[%c0_5, %c0_6], %10 {strides = array<i32>} : memref<10x128xf32, #tpu.memory_space<vmem>>, vector<10x128xf32>,
    return
  }
  func.func @transform_0(%arg0: i32) -> (i32, i32) {
    %c0_i32 = arith.constant 0 : i32
    %c0_i32_0 = arith.constant 0 : i32
    return %c0_i32, %arg0 : i32, i32
  }
  func.func @transform_1(%arg0: i32) -> (i32, i32) {
    %c0_i32 = arith.constant 0 : i32
    %c0_i32_0 = arith.constant 0 : i32
    %c0_i32_1 = arith.constant 0 : i32
    return %c0_i32, %c0_i32_0 : i32, i32
  }
  func.func @transform_2(%arg0: i32) -> (i32, i32) {
    %c0_i32 = arith.constant 0 : i32
    %c0_i32_0 = arith.constant 0 : i32
    return %c0_i32, %arg0 : i32, i32
  }
  func.func @transform_3(%arg0: i32) -> (i32, i32) {
    %c0_i32 = arith.constant 0 : i32
    %c0_i32_0 = arith.constant 0 : i32
    return %c0_i32, %arg0 : i32, i32
  }
}

</mosaic_0001>

<bundles_post_ra>
// kernel: tpu_custom_call.1
= control target key start
LH: loop header
LB: loop body
LE: loop exit
PB: predicated region body
PF: predicated region fallthrough
CT: control target
= control target key end

     0   :  { %8 = vsyncpa [#allocation4], 0  ;;  %s1375_s0 = inlined_call_operand.vmem [shape: f32[11,256], index: 0, kind: input, shape index: {}]   ;;  %s1376_s1 = inlined_call_operand.vmem [shape: f32[32,11], index: 1, kind: input, shape index: {}]   ;;  %s1377_s2 = inlined_call_operand.vmem [shape: s32[1,256], index: 2, kind: input, shape index: {}]   ;;  %s1378_s3 = inlined_call_operand.hbm [shape: f32[10,256], index: 3, kind: output, shape index: {}]  }
   0x1   :  { %10 = vsyncpa [#allocation4 + $0x1], 0  ;;  %s1218_s12 = smov 0   ;;  %s1220_s13 = smov 0  }
   0x2   :  { %s1222_s14 = smov 0   ;;  %s1224_s15 = smov 0  }
   0x3 LB: > { %s1239_s16 = sadd.s32 4294967295, %s1191_s15   ;;  %s934_s17 = sadd.s32 4294967294, %s1191_s15   ;;  %s1191_s15 = sphi %s1224_s15, %s1384_s15   ;;  %s1187_s14 = sphi %s1222_s14, %s1383_s14   ;;  %s1183_s13 = sphi %s1220_s13, %s1382_s13   ;;  %s1179_s12 = sphi %s1218_s12, %s1381_s12  }
   0x4   : > { %s1243_s18 = sadd.s32 1, %s1191_s15   ;;  %s23_s19 = sadd.s32 1, %s1187_s14 }
   0x5   : > { %s20_s20 = ssub.s32 %s1191_s15, %s1243_s18  ;;  %p30_p0 = scmp.ne.s32.totalorder %s1187_s14, %s1183_s13 }
   0x6   : > { %p21_p1 = scmp.eq.s32.totalorder %s20_s20, 0  ;;  %p31_p2 = scmp.eq.s32.totalorder %s1191_s15, 0 }
   0x7   : > { %p107_p3 = scmp.eq.s32.totalorder %s1239_s16, 1  ;;  %p112_p4 = scmp.ne.s32.totalorder %s1183_s13, %s1179_s12 }
   0x8   : > { %s1255_s21 = scalar_select %p21_p1, %s1187_s14, %s23_s19  }
   0x9   : > { %p32_p5 = por %p31_p2, %p30_p0  ;;  %p1257_p6 = por %p107_p3, %p30_p0 }
   0xa   : > { %p113_p7 = scmp.eq.s32.totalorder %s934_s17, 1  ;;  %p936_p9 = scmp.ge.s32.totalorder %s1191_s15, 2 }
   0xc   : > { %p1261_p8 = por %p113_p7, %p112_p4  ;;  %132 = sbr.rel (%p936_p9) target bundleno = 26 (0x1a), region = 20 }
  0x13   : > { %135 = sbr.rel (!%p32_p5) target bundleno = 26 (0x1a), region = 24  ;;  %s137_s24 = sand.u32 (%p32_p5), 1, %s1187_s14  }
  0x14   : > { %s938_s25 = sshll.u32 (%p32_p5), %s1191_s15, 3  ;;  %s937_s26 = sshll.u32 (%p32_p5), %s137_s24, 4 }
  0x15   : > { %s141_s29 = scalar_lea.vmem (%p32_p5), %s1375_s0, %s938_s25  ;;  %s139_s30 = scalar_lea.vmem (%p32_p5), [#allocation2], %s937_s26 }
  0x16   : > { %v171_v0 = vld [vmem:[%s141_s29] sm:$0xff] (%p32_p5)  ;;  %v173_v1 = vld [vmem:[%s141_s29 + $0x10] sm:$0xff] (%p32_p5) }
  0x17   : > { %172 = vst [vmem:[%s139_s30] sm:$0xff] (%p32_p5), %v171_v0  ;;  %174 = vst [vmem:[%s139_s30 + $0x8] sm:$0xff] (%p32_p5), %v173_v1 }
  0x1a PF: > { %p939_p10 = scmp.ge.s32.totalorder %s1191_s15, 1  ;;  %p185_p11 = scmp.lt.s32.totalorder %s1191_s15, 3 }
  0x1c   : > { %p186_p12 = pnand %p939_p10, %p185_p11 }
  0x1d   : > { %s192_s4 = sand.u32 (!%p186_p12), 1, %s1183_s13   ;;  %v221_v2 = vld [vmem:[%s1376_s1] sm:$0xff] (!%p186_p12)  ;;  %vm227_vm0 = vcmask (!%p186_p12), 89088   ;;  %v222_v3 = vld [vmem:[%s1376_s1 + $0x8] sm:$0xff] (!%p186_p12)  ;;  %v223_v4 = vld [vmem:[%s1376_s1 + $0x10] sm:$0xff] (!%p186_p12)  ;;  %vm240_vm1 = vcmask (!%p186_p12), 1042432   ;;  %v835_v47 = vlaneseq (!%p186_p12) }
  0x1e   : > { %189 = sbr.rel (%p186_p12) target bundleno = 295 (0x127), region = 66  ;;  %s1287_s11 = sshll.u32 (!%p186_p12), %s192_s4, 4  ;;  %v229_v5 = vsel (!%p186_p12), %vm227_vm0, %v221_v2, 0  ;;  %v232_v6 = vsel (!%p186_p12), %vm227_vm0, %v222_v3, 0  ;;  %v235_v7 = vsel (!%p186_p12), %vm227_vm0, %v223_v4, 0  ;;  %v224_v8 = vld [vmem:[%s1376_s1 + $0x18] sm:$0xff] (!%p186_p12) }
  0x1f   : > { %v1292_v9 = vand.u32 (!%p186_p12), 4294901760, %v229_v5  ;;  %v1294_v10 = vand.u32 (!%p186_p12), 4294901760, %v232_v6  ;;  %v1296_v11 = vand.u32 (!%p186_p12), 4294901760, %v235_v7  ;;  %v238_v12 = vsel (!%p186_p12), %vm227_vm0, %v224_v8, 0  ;;  %s194_s20 = scalar_lea.vmem (!%p186_p12), [#allocation2], %s1287_s11  ;;  %p218_p13 = scmp.lt.s32.totalorder (!%p186_p12), %s1239_s16, 1 }
  0x20   : > { %v225_v13 = vld [vmem:[%s194_s20] sm:$0xff] (!%p186_p12)  ;;  %v226_v14 = vld [vmem:[%s194_s20 + $0x8] sm:$0x7] (!%p186_p12)  ;;  %v1299_v15 = vand.u32 (!%p186_p12), 4294901760, %v238_v12  ;;  %v836_v49 = vshrl.u32 (!%p186_p12), %v835_v47, 7  ;;  %v1193_v51 = vmov (!%p186_p12), 0  }
  0x21   : > { %v242_v16 = vsel (!%p186_p12), %vm240_vm1, %v226_v14, 0  ;;  %v245_v17 = vand.u32 (!%p186_p12), 4294901760, %v225_v13  ;;  %v312_v18 = vsub.f32 (!%p186_p12), %v229_v5, %v1292_v9  ;;  %v322_v19 = vsub.f32 (!%p186_p12), %v232_v6, %v1294_v10  ;;  %s217_s28 = scalar_lea.vmem (!%p186_p12), [#allocation3], %s1287_s11  ;;  %s943_s30 = sshll.u32 (!%p186_p12), %s1239_s16, 7 }
  0x22   : > { %v248_v20 = vand.u32 (!%p186_p12), 4294901760, %v242_v16  ;;  %v332_v21 = vsub.f32 (!%p186_p12), %v235_v7, %v1296_v11  ;;  %v342_v22 = vsub.f32 (!%p186_p12), %v238_v12, %v1299_v15  ;;  %v837_v50 = vsub.s32 (!%p186_p12), 0, %v836_v49  ;;  %s857_s29 = sshll.u32 (!%p186_p12), %s217_s28, 4  ;;  %s1329_s7 = scalar_lea.hbm (!%p186_p12), %s1378_s3, %s943_s30  ;;  %s1324_s29 = int_to_ptr.vmem [resolvable:$true] %s857_s29 }
  0x23   : > { %v313_v23 = vand.u32 (!%p186_p12), 4294901760, %v312_v18  ;;  %v323_v24 = vand.u32 (!%p186_p12), 4294901760, %v322_v19  ;;  %v353_v25 = vsub.f32 (!%p186_p12), %v225_v13, %v245_v17  ;;  %s1129_s8 = scalar_lea.vmem (!%p186_p12), %s1324_s29, 256  ;;  %s1194_s9 = smov (!%p186_p12), [#allocation3]  }
  0x24   : > { %v1042_v26 = vpack.c.bf16 (!%p186_p12), %v248_v20, %v245_v17  ;;  %v333_v27 = vand.u32 (!%p186_p12), 4294901760, %v332_v21  ;;  %v343_v28 = vand.u32 (!%p186_p12), 4294901760, %v342_v22  ;;  %v360_v29 = vsub.f32 (!%p186_p12), %v242_v16, %v248_v20  ;;  %p1130_p0 = scmp.ne.s32.totalorder (!%p186_p12), %s1324_s29, %s1129_s8  ;;  %s1133_s10 = sshll.u32 (!%p186_p12), %s1194_s9, 4  ;;  %s1134_s10 = int_to_ptr.vmem [resolvable:$false] %s1133_s10 }
  0x25   : > { %v314_v30 = vsub.f32 %v312_v18, %v313_v23  ;;  %1016 = vmatprep.mubr.f32.mxu0 %v313_v23  ;;  %v324_v31 = vsub.f32 %v322_v19, %v323_v24  ;;  %v354_v32 = vand.u32 4294901760, %v353_v25  ;;  %s219_s24 = scalar_select %p218_p13, %s1239_s16, 1 }
  0x26   : > { %1043 = vmatprep.subr.bf16.mxu1 %v1042_v26  ;;  %1055 = vmatprep.subr.bf16.mxu0 %v1042_v26  ;;  %v334_v33 = vsub.f32 %v332_v21, %v333_v27  ;;  %v344_v34 = vsub.f32 %v342_v22, %v343_v28  ;;  %v361_v35 = vand.u32 4294901760, %v360_v29  ;;  %v1050_v46 = vpack.c.bf16 %v360_v29, %v353_v25  ;;  %s1333_s16 = scalar_lea.sflag [#allocation4], %s192_s4  ;;  %p1131_p1 = pnand %p1130_p0, %p1257_p6 }
  0x27   : > { %1045 = vmatpush3.bf16.msra.mxu1 %v1042_v26  ;;  %1057 = vmatpush3.bf16.msra.mxu0 %v1042_v26  ;;  %v315_v36 = vand.u32 4294901760, %v314_v30  ;;  %v325_v37 = vand.u32 4294901760, %v324_v31  ;;  %v355_v38 = vsub.f32 %v353_v25, %v354_v32  ;;  %s220_s27 = scalar_lea.vmem %s1377_s2, %s219_s24  ;;  %s1135_s11 = scalar_lea.vmem %s1134_s10, 512 }
  0x28   : > { %v335_v39 = vand.u32 4294901760, %v334_v33  ;;  %v362_v40 = vsub.f32 %v360_v29, %v361_v35  ;;  %v1058_v41 = vpack.c.bf16 %v361_v35, %v354_v32  ;;  %v345_v43 = vand.u32 4294901760, %v344_v34  ;;  %v832_v48 = vld [vmem:[%s220_s27] sm:$0x1]  ;;  %p1132_p2 = pneg %p1131_p1  ;;  %p1136_p3 = scmp.lt.s32.totalorder %s1324_s29, %s1134_s10 }
  0x29   : > { %986 = vmatprep.mubr.f32.mxu1 %v315_v36  ;;  %v356_v42 = vand.u32 4294901760, %v355_v38  ;;  %vm833_vm2 = vcmp.eq.s32.totalorder %v832_v48, 0  ;;  %p1137_p4 = scmp.lt.s32.totalorder %s1135_s11, %s1129_s8 }
  0x2a   : > { %987 = vmatmul.mubr.f32.vlgmr.msra.gmra.mrb[0].mxu1 %v325_v37  ;;  %1017 = vmatmul.mubr.f32.vlgmr.msra.gmra.mrb[0].mxu0 %v323_v24  ;;  %v363_v44 = vand.u32 4294901760, %v362_v40  ;;  %v834_v52 = vsel %vm833_vm2, 1, %v1193_v51 }
  0x2b   : > { %989 = vmatprep.mubr.f32.mxu1 %v335_v39  ;;  %1019 = vmatprep.mubr.f32.mxu0 %v333_v27  ;;  %v838_v56 = vrot.slane %v834_v52, %v837_v50  ;;  %p1138_p5 = por %p1137_p4, %p1136_p3 }
  0x2c   : > { %v1046_v45 = vpack.c.bf16 %v363_v44, %v356_v42  ;;  %1059 = vmatprep.subr.bf16.mxu0 %v1058_v41 }
  0x2d   : > { %1061 = vmatpush3.bf16.msra.mxu0 %v1058_v41  ;;  %vm839_vm3 = vcmp.eq.s32.totalorder %v838_v56, 1  ;;  %p1139_p7 = pnand %p1138_p5, %p1132_p2 }
  0x2e   : > { %990 = vmatmul.mubr.f32.gmra.mrb[2].mxu1 %v345_v43  ;;  %1047 = vmatprep.subr.bf16.mxu1 %v1046_v45 }
  0x2f   : > { %1020 = vmatmul.mubr.f32.gmra.mrb[2].mxu0 %v343_v28  ;;  %1049 = vmatpush3.bf16.msra.mxu1 %v1046_v45 }
  0x30   : > { %996 = vmatprep.mubr.f32.mxu1 %v1292_v9  ;;  %1026 = vmatprep.mubr.f32.mxu0 %v1292_v9 }
  0x31   : > { %1051 = vmatprep.subr.bf16.mxu1 %v1050_v46  ;;  %1063 = vmatprep.subr.bf16.mxu0 %v1042_v26 }
  0x32   : > { %997 = vmatmul.mubr.f32.vlgmr.msra.gmra.mrb[0].mxu1 %v1294_v10 }
  0x33   : > { %1027 = vmatmul.mubr.f32.vlgmr.msra.gmra.mrb[0].mxu0 %v1294_v10  ;;  %999 = vmatprep.mubr.f32.mxu1 %v1296_v11 }
  0x34   : > { %1029 = vmatprep.mubr.f32.mxu0 %v1296_v11  ;;  %1053 = vmatpush3.bf16.msra.mxu1 %v1050_v46 }
  0x35   : > { %1065 = vmatpush3.bf16.msra.mxu0 %v1042_v26 }
  0x36   : > { %1000 = vmatmul.mubr.f32.gmra.mrb[2].mxu1 %v1299_v15 }
  0x37   : > { %1030 = vmatmul.mubr.f32.gmra.mrb[2].mxu0 %v1299_v15  ;;  %1006 = vmatprep.mubr.f32.mxu1 %v312_v18 }
  0x38   : > { %1036 = vmatprep.mubr.f32.mxu0 %v1292_v9 }
  0x3a   : > { %1007 = vmatmul.mubr.f32.vlgmr.msra.gmra.mrb[0].mxu1 %v322_v19 }
  0x3b   : > { %1037 = vmatmul.mubr.f32.vlgmr.msra.gmra.mrb[0].mxu0 %v1294_v10  ;;  %1009 = vmatprep.mubr.f32.mxu1 %v332_v21 }
  0x3c   : > { %1039 = vmatprep.mubr.f32.mxu0 %v1296_v11 }
  0x3e   : > { %1010 = vmatmul.mubr.f32.gmra.mrb[2].mxu1 %v342_v22 }
  0x3f   : > { %1040 = vmatmul.mubr.f32.gmra.mrb[2].mxu0 %v1299_v15 }
 0x10d   : > { %v1008_v53 = vpop.f32.mrb[0].mxu1 }
 0x10e   : > { %v1038_v54 = vpop.f32.mrb[0].mxu0  ;;  %v522_v55 = vpop.f32.mrb[1].mxu1 }
 0x10f   : > { %v1066_v57 = vadd.f32 %v1038_v54, %v1008_v53  ;;  %v810_v58 = vpop.f32.mrb[1].mxu0 }
 0x110   : > { %v1067_v59 = vadd.f32 %v810_v58, %v522_v55 }
 0x111   : > { %v1011_v60 = vpop.f32.mrb[2].mxu1 }
 0x112   : > { %v1041_v61 = vpop.f32.mrb[2].mxu0  ;;  %v536_v62 = vpop.f32.mrb[3].mxu1 }
 0x113   : > { %v1068_v63 = vadd.f32 %v1041_v61, %v1011_v60  ;;  %v822_v0 = vpop.f32.mrb[3].mxu0 }
 0x114   : > { %v1069_v1 = vadd.f32 %v822_v0, %v536_v62 }
 0x115   : > { %v841_v2 = vsel %vm839_vm3, %v1066_v57, %v1068_v63 }
 0x116   : > { %843 = vst [vmem:[%s217_s28 + $0x8] sm:$0x3] %v841_v2  ;;  %v840_v3 = vsel %vm839_vm3, %v1067_v59, %v1069_v1 }
 0x117   : > { %842 = vst [vmem:[%s217_s28] sm:$0xff] %v840_v3 }
 0x118   : > { %1142 = shalt.err (!%p1139_p7)
}
 0x119   : > { %s1143_s4 = scalar_lea.hbm %s1329_s7, 256  ;;  %s1147_s20 = scalar_lea.hbm %s1378_s3, 512 }
 0x11a   : > { %p1144_p10 = scmp.ne.s32.totalorder %s1329_s7, %s1143_s4  ;;  %p1148_p13 = scmp.lt.u32.totalorder %s1329_s7, %s1378_s3 }
 0x11b   : > { %p1149_p0 = scmp.lt.u32.totalorder %s1147_s20, %s1143_s4  ;;  %p1151_p2 = scmp.lt.u32.totalorder %s1143_s4, %s1329_s7 }
 0x11c   : > { %p1145_p11 = pnand %p1144_p10, %p1257_p6 }
 0x11d   : > { %p1150_p1 = por %p1149_p0, %p1148_p13 }
 0x11e   : > { %p1146_p12 = pneg %p1145_p11 }
 0x11f   : > { %p1152_p3 = por %p1151_p2, %p1150_p1 }
 0x121   : > { %p1153_p4 = pnand %p1152_p3, %p1146_p12 }
 0x123   : > { %1156 = shalt.err (!%p1153_p4)
}
 0x124   : > { %s1195_s26 = smov 128   ;;  %s1196_s27 = smov 256  }
 0x125   : > { %s1197_s28 = smov 8  }
 0x126   : > { %1086 = dma.vmem_to_hbm [thread:$0]  (%p1257_p6), %s1324_s29, 256, %s1329_s7, %s1333_s16, %s1195_s26, %s1196_s27, %s1197_s28  }
 0x127 PF: > { %s872_s30 = sand.u32 1, %s1179_s12   ;;  %p1089_p5 = pnand %p936_p9, %p1261_p8 }
 0x128   : > { %s873_s5 = scalar_lea.sflag [#allocation4], %s872_s30 }
 0x129   : > { %1174 = dma.done.wait (!%p1089_p5), %s873_s5, 256  }
 0x12a   : > { %1176 = vsyncadd (!%p1089_p5), %s873_s5, 4294967040  ;;  %p13_p7 = scmp.ge.s32.totalorder %s1243_s18, 4   ;;  %s1381_s12 = smov %s1183_s13 }
 0x12b   : > { %s1382_s13 = smov %s1187_s14  ;;  %s1383_s14 = smov %s1255_s21 }
 0x12c   : > { %s1384_s15 = smov %s1243_s18  ;;  %15 = sbr.rel (!%p13_p7) target bundleno = 3 (0x3), region = 113 }
 0x133   :  { %878 = vsyncpa [#allocation4], 1 }
 0x134   :  { %880 = vsyncpa [#allocation4 + $0x1], 1 }

</bundles_post_ra>
